<compile_context>
chip_gen: v6e
topology: v6e:2x2x1
jax: 0.10.0
libtpu: 0.0.40
codegen_flags: <defaults>
</compile_context>

<pallas_src>
import functools

import jax
import jax.numpy as jnp
from jax.experimental import pallas as pl
from jax.experimental.pallas import tpu as pltpu


def _outputcv_kernel(xe_ref, w1_ref, b1_ref, w2_ref, mask_ref, out_ref, y_ref,
                     *, H, W, Cin):
    # xe_ref  : (1, Cin, S_in)  flat zero-padded input (one batch element)
    # w1_ref  : (Cin, 9*Cin)    conv1 weights (BN scale folded), im2col layout
    # b1_ref  : (Cin, 1)        folded BN shift (beta - mean*scale)
    # w2_ref  : (Cp, 9*Cin)     conv2 weights (out-channels padded to Cp)
    # mask_ref: (1, Q)          1.0 on interior of the padded grid, 0.0 on border
    # out_ref : (1, Cp, E)      lane-dense output, already NCHW-ordered
    # y_ref   : (Cin, Q+2)      VMEM scratch: 1-padded intermediate activation
    Wp = W + 2
    Q = (H + 2) * Wp           # conv1 output length (full 1-padded grid)
    E = H * Wp                 # conv2 output length (H rows incl. 2 junk cols)
    offs = [dy * Wp + dx for dy in range(3) for dx in range(3)]

    # ---- conv1: single im2col matmul, (Cin, 9*Cin) @ (9*Cin, Q)
    patches1 = jnp.concatenate([xe_ref[0, :, o:o + Q] for o in offs], axis=0)
    acc1 = jnp.dot(w1_ref[...], patches1, preferred_element_type=jnp.float32)

    # ---- folded BN shift + ReLU, then zero the halo so the scratch holds the
    #      correctly zero-padded input of conv2.
    y1 = jnp.maximum(acc1 + b1_ref[...], 0.0) * mask_ref[...]
    y_ref[:, :Q] = y1
    # tiny 2-lane tail read by the overhanging taps of the last row
    y_ref[:, Q:] = jnp.zeros((Cin, y_ref.shape[1] - Q), jnp.float32)

    # ---- conv2: single im2col matmul, (Cp, 9*Cin) @ (9*Cin, E)
    patches2 = jnp.concatenate([y_ref[:, o:o + E] for o in offs], axis=0)
    acc2 = jnp.dot(w2_ref[...], patches2, preferred_element_type=jnp.float32)

    out_ref[0] = acc2.astype(out_ref.dtype)


def output_cv_block(x_nchw, w1, bn_gamma, bn_beta, bn_mean, bn_var, w2,
                    eps=1e-5):
    """Forward pass of OutputCvBlock.

    x_nchw: (N, Cin, H, W); torch-style weights w1: (Cin, Cin, 3, 3),
    w2: (Cout, Cin, 3, 3); BatchNorm in inference mode (running stats).
    Returns (N, Cout, H, W)."""
    N, Cin, H, W = x_nchw.shape
    Cout = w2.shape[0]
    Wp = W + 2
    Q = (H + 2) * Wp                 # flat length of the 1-padded grid
    E = H * Wp                       # flat length of the kernel output
    L = Wp + 1                       # lead/tail flat pad so every tap slice is in-bounds
    S_in = Q + 2 * L
    Cp = ((Cout + 7) // 8) * 8       # pad conv2 out-channels to a full sublane group

    # Fold inference BatchNorm into conv1 (plain-JAX glue).
    scale = bn_gamma / jnp.sqrt(bn_var + eps)          # (Cin,)
    shift = bn_beta - bn_mean * scale                  # (Cin,)

    # torch conv weight (out, in, kh, kw) -> (out, kh, kw, in) -> (out, 9*in),
    # matching the tap stacking order (dy, dx) used in the kernel.
    w1_m = jnp.transpose(w1, (0, 2, 3, 1)).reshape(Cin, 9 * Cin) * scale[:, None]
    w2_m = jnp.transpose(w2, (0, 2, 3, 1)).reshape(Cout, 9 * Cin)
    w2_m = jnp.pad(w2_m, ((0, Cp - Cout), (0, 0)))
    b1 = shift.reshape(Cin, 1)

    # NCHW -> zero-pad spatial by 1 -> flatten spatial -> pad flat axis by L on
    # both sides (so tap slices at offsets 0..2*(W+2)+2 never go out of bounds).
    xp = jnp.pad(x_nchw, ((0, 0), (0, 0), (1, 1), (1, 1)))       # (N, Cin, H+2, W+2)
    xe = jnp.pad(xp.reshape(N, Cin, Q), ((0, 0), (0, 0), (L, L)))  # (N, Cin, S_in)

    # Border mask in flat padded coordinates: 1 on the H x W interior, 0 on the
    # 1-wide halo, so masked conv1 output == zero-padded intermediate.
    rr, ss = jnp.meshgrid(jnp.arange(H + 2), jnp.arange(Wp), indexing="ij")
    mask = ((rr >= 1) & (rr <= H) & (ss >= 1) & (ss <= W)).astype(
        jnp.float32).reshape(1, Q)

    kernel = functools.partial(_outputcv_kernel, H=H, W=W, Cin=Cin)

    out_flat = pl.pallas_call(
        kernel,
        out_shape=jax.ShapeDtypeStruct((N, Cp, E), x_nchw.dtype),
        grid_spec=pltpu.PrefetchScalarGridSpec(
            num_scalar_prefetch=0,
            grid=(N,),
            in_specs=[
                pl.BlockSpec((1, Cin, S_in), lambda n: (n, 0, 0)),
                pl.BlockSpec((Cin, 9 * Cin), lambda n: (0, 0)),
                pl.BlockSpec((Cin, 1), lambda n: (0, 0)),
                pl.BlockSpec((Cp, 9 * Cin), lambda n: (0, 0)),
                pl.BlockSpec((1, Q), lambda n: (0, 0)),
            ],
            out_specs=pl.BlockSpec((1, Cp, E), lambda n: (n, 0, 0)),
            scratch_shapes=[pltpu.VMEM((Cin, Q + 2), jnp.float32)],
        ),
        compiler_params=pltpu.CompilerParams(
            dimension_semantics=("parallel",)),
    )(xe, w1_m, b1, w2_m, mask)

    # (N, Cp, H*(W+2)) is already NCHW-ordered: just drop the channel padding
    # and the 2 junk columns per row (cheap XLA slice, no transpose).
    return out_flat.reshape(N, Cp, H, Wp)[:, :Cout, :, :W]


def _reference(x, w1, gamma, beta, mean, var, w2, eps=1e-5):
    """Pure-JAX reference matching torch Conv2d/BatchNorm2d(eval)/ReLU/Conv2d."""
    dn = ("NCHW", "OIHW", "NCHW")
    y = jax.lax.conv_general_dilated(x, w1, (1, 1), ((1, 1), (1, 1)),
                                     dimension_numbers=dn)
    y = ((y - mean[None, :, None, None])
         / jnp.sqrt(var[None, :, None, None] + eps)
         * gamma[None, :, None, None] + beta[None, :, None, None])
    y = jnp.maximum(y, 0.0)
    return jax.lax.conv_general_dilated(y, w2, (1, 1), ((1, 1), (1, 1)),
                                        dimension_numbers=dn)


if __name__ == "__main__":
    N, Cin, Cout, H, W = 2, 16, 4, 16, 16

    key = jax.random.PRNGKey(0)
    kx, k1, k2, kg, kb, km, kv = jax.random.split(key, 7)

    x = jax.random.normal(kx, (N, Cin, H, W), jnp.float32)
    w1 = 0.1 * jax.random.normal(k1, (Cin, Cin, 3, 3), jnp.float32)
    w2 = 0.1 * jax.random.normal(k2, (Cout, Cin, 3, 3), jnp.float32)
    bn_gamma = 1.0 + 0.1 * jax.random.normal(kg, (Cin,), jnp.float32)
    bn_beta = 0.1 * jax.random.normal(kb, (Cin,), jnp.float32)
    bn_mean = 0.1 * jax.random.normal(km, (Cin,), jnp.float32)
    bn_var = jnp.abs(jax.random.normal(kv, (Cin,), jnp.float32)) + 0.5

    out = output_cv_block(x, w1, bn_gamma, bn_beta, bn_mean, bn_var, w2)
    out = jax.block_until_ready(out)

    ref = _reference(x, w1, bn_gamma, bn_beta, bn_mean, bn_var, w2)
    assert out.shape == (N, Cout, H, W)
    err = float(jnp.max(jnp.abs(out - ref)))
    assert jnp.allclose(out, ref, atol=5e-4, rtol=5e-4), f"max abs err = {err}"

    print("KERNEL_OK")
</pallas_src>

<mosaic_0001>
module attributes {stable_mosaic.version = 11 : i64} {
  func.func @_outputcv_kernel(%arg0: i32, %arg1: memref<1x16x362xf32, #tpu.memory_space<vmem>>, %arg2: memref<16x144xf32, #tpu.memory_space<vmem>>, %arg3: memref<16x1xf32, #tpu.memory_space<vmem>>, %arg4: memref<8x144xf32, #tpu.memory_space<vmem>>, %arg5: memref<1x324xf32, #tpu.memory_space<vmem>>, %arg6: memref<1x8x288xf32, #tpu.memory_space<vmem>>, %arg7: memref<16x326xf32, #tpu.memory_space<vmem>>) attributes {dimension_semantics = [#tpu.dimension_semantics<parallel>], iteration_bounds = array<i64: 2>, scalar_prefetch = 0 : i64, scratch_operands = 1 : i64, tpu.core_type = #tpu.core_type<tc>, window_params = [{transform_indices = @transform_0, window_bounds = array<i64: 1, 16, 362>}, {pipeline_mode = #tpu.pipeline_mode<synchronous>, transform_indices = @transform_1, window_bounds = array<i64: 16, 144>}, {pipeline_mode = #tpu.pipeline_mode<synchronous>, transform_indices = @transform_2, window_bounds = array<i64: 16, 1>}, {pipeline_mode = #tpu.pipeline_mode<synchronous>, transform_indices = @transform_3, window_bounds = array<i64: 8, 144>}, {pipeline_mode = #tpu.pipeline_mode<synchronous>, transform_indices = @transform_4, window_bounds = array<i64: 1, 324>}, {transform_indices = @transform_5, window_bounds = array<i64: 1, 8, 288>}]} {
    %c0 = arith.constant 0 : index
    %c0_0 = arith.constant 0 : index
    %c0_1 = arith.constant 0 : index
    %0 = vector.load %arg1[%c0, %c0_0, %c0_1] : memref<1x16x362xf32, #tpu.memory_space<vmem>>, vector<1x16x324xf32>
    %1 = vector.shape_cast %0 : vector<1x16x324xf32> to vector<16x324xf32>
    %c0_2 = arith.constant 0 : index
    %c0_3 = arith.constant 0 : index
    %c1 = arith.constant 1 : index
    %2 = vector.load %arg1[%c0_2, %c0_3, %c1] : memref<1x16x362xf32, #tpu.memory_space<vmem>>, vector<1x16x324xf32>
    %3 = vector.shape_cast %2 : vector<1x16x324xf32> to vector<16x324xf32>
    %c0_4 = arith.constant 0 : index
    %c0_5 = arith.constant 0 : index
    %c2 = arith.constant 2 : index
    %4 = vector.load %arg1[%c0_4, %c0_5, %c2] : memref<1x16x362xf32, #tpu.memory_space<vmem>>, vector<1x16x324xf32>
    %5 = vector.shape_cast %4 : vector<1x16x324xf32> to vector<16x324xf32>
    %c0_6 = arith.constant 0 : index
    %c0_7 = arith.constant 0 : index
    %c18 = arith.constant 18 : index
    %6 = vector.load %arg1[%c0_6, %c0_7, %c18] : memref<1x16x362xf32, #tpu.memory_space<vmem>>, vector<1x16x324xf32>
    %7 = vector.shape_cast %6 : vector<1x16x324xf32> to vector<16x324xf32>
    %c0_8 = arith.constant 0 : index
    %c0_9 = arith.constant 0 : index
    %c19 = arith.constant 19 : index
    %8 = vector.load %arg1[%c0_8, %c0_9, %c19] : memref<1x16x362xf32, #tpu.memory_space<vmem>>, vector<1x16x324xf32>
    %9 = vector.shape_cast %8 : vector<1x16x324xf32> to vector<16x324xf32>
    %c0_10 = arith.constant 0 : index
    %c0_11 = arith.constant 0 : index
    %c20 = arith.constant 20 : index
    %10 = vector.load %arg1[%c0_10, %c0_11, %c20] : memref<1x16x362xf32, #tpu.memory_space<vmem>>, vector<1x16x324xf32>
    %11 = vector.shape_cast %10 : vector<1x16x324xf32> to vector<16x324xf32>
    %c0_12 = arith.constant 0 : index
    %c0_13 = arith.constant 0 : index
    %c36 = arith.constant 36 : index
    %12 = vector.load %arg1[%c0_12, %c0_13, %c36] : memref<1x16x362xf32, #tpu.memory_space<vmem>>, vector<1x16x324xf32>
    %13 = vector.shape_cast %12 : vector<1x16x324xf32> to vector<16x324xf32>
    %c0_14 = arith.constant 0 : index
    %c0_15 = arith.constant 0 : index
    %c37 = arith.constant 37 : index
    %14 = vector.load %arg1[%c0_14, %c0_15, %c37] : memref<1x16x362xf32, #tpu.memory_space<vmem>>, vector<1x16x324xf32>
    %15 = vector.shape_cast %14 : vector<1x16x324xf32> to vector<16x324xf32>
    %c0_16 = arith.constant 0 : index
    %c0_17 = arith.constant 0 : index
    %c38 = arith.constant 38 : index
    %16 = vector.load %arg1[%c0_16, %c0_17, %c38] : memref<1x16x362xf32, #tpu.memory_space<vmem>>, vector<1x16x324xf32>
    %17 = vector.shape_cast %16 : vector<1x16x324xf32> to vector<16x324xf32>
    %18 = tpu.concatenate %1, %3, %5, %7, %9, %11, %13, %15, %17 in 0 : vector<16x324xf32>, vector<16x324xf32>, vector<16x324xf32>, vector<16x324xf32>, vector<16x324xf32>, vector<16x324xf32>, vector<16x324xf32>, vector<16x324xf32>, vector<16x324xf32> -> vector<144x324xf32>
    %c0_18 = arith.constant 0 : index
    %c0_19 = arith.constant 0 : index
    %19 = vector.load %arg2[%c0_18, %c0_19] : memref<16x144xf32, #tpu.memory_space<vmem>>, vector<16x144xf32>
    %cst = arith.constant dense<0.000000e+00> : vector<16x324xf32>
    %20 = tpu.matmul %19, %18, %cst {dimension_numbers = #tpu.dot_dimension_numbers<[1], [0], [0], [1], [0, 0, 1, 1], [], []>} : vector<16x144xf32>, vector<144x324xf32>, vector<16x324xf32> -> vector<16x324xf32>
    %c0_20 = arith.constant 0 : index
    %c0_21 = arith.constant 0 : index
    %21 = vector.load %arg3[%c0_20, %c0_21] : memref<16x1xf32, #tpu.memory_space<vmem>>, vector<16x1xf32>
    %22 = vector.broadcast %21 : vector<16x1xf32> to vector<16x324xf32>
    %23 = arith.addf %20, %22 : vector<16x324xf32>
    %cst_22 = arith.constant 0.000000e+00 : f32
    %24 = vector.broadcast %cst_22 : f32 to vector<16x324xf32>
    %25 = arith.maximumf %23, %24 : vector<16x324xf32>
    %c0_23 = arith.constant 0 : index
    %c0_24 = arith.constant 0 : index
    %26 = vector.load %arg5[%c0_23, %c0_24] : memref<1x324xf32, #tpu.memory_space<vmem>>, vector<1x324xf32>
    %27 = vector.broadcast %26 : vector<1x324xf32> to vector<16x324xf32>
    %28 = arith.mulf %25, %27 : vector<16x324xf32>
    %c0_25 = arith.constant 0 : index
    %c0_26 = arith.constant 0 : index
    %29 = vector.load %arg7[%c0_25, %c0_26] : memref<16x326xf32, #tpu.memory_space<vmem>>, vector<16x324xf32>
    tpu.vector_store %arg7[%c0_25, %c0_26], %28 {strides = array<i32>} : memref<16x326xf32, #tpu.memory_space<vmem>>, vector<16x324xf32>,
    %cst_27 = arith.constant 0.000000e+00 : f32
    %30 = vector.broadcast %cst_27 : f32 to vector<16x2xf32>
    %c0_28 = arith.constant 0 : index
    %c324 = arith.constant 324 : index
    %31 = vector.load %arg7[%c0_28, %c324] : memref<16x326xf32, #tpu.memory_space<vmem>>, vector<16x2xf32>
    tpu.vector_store %arg7[%c0_28, %c324], %30 {strides = array<i32>} : memref<16x326xf32, #tpu.memory_space<vmem>>, vector<16x2xf32>,
    %c0_29 = arith.constant 0 : index
    %c0_30 = arith.constant 0 : index
    %32 = vector.load %arg7[%c0_29, %c0_30] : memref<16x326xf32, #tpu.memory_space<vmem>>, vector<16x288xf32>
    %c0_31 = arith.constant 0 : index
    %c1_32 = arith.constant 1 : index
    %33 = vector.load %arg7[%c0_31, %c1_32] : memref<16x326xf32, #tpu.memory_space<vmem>>, vector<16x288xf32>
    %c0_33 = arith.constant 0 : index
    %c2_34 = arith.constant 2 : index
    %34 = vector.load %arg7[%c0_33, %c2_34] : memref<16x326xf32, #tpu.memory_space<vmem>>, vector<16x288xf32>
    %c0_35 = arith.constant 0 : index
    %c18_36 = arith.constant 18 : index
    %35 = vector.load %arg7[%c0_35, %c18_36] : memref<16x326xf32, #tpu.memory_space<vmem>>, vector<16x288xf32>
    %c0_37 = arith.constant 0 : index
    %c19_38 = arith.constant 19 : index
    %36 = vector.load %arg7[%c0_37, %c19_38] : memref<16x326xf32, #tpu.memory_space<vmem>>, vector<16x288xf32>
    %c0_39 = arith.constant 0 : index
    %c20_40 = arith.constant 20 : index
    %37 = vector.load %arg7[%c0_39, %c20_40] : memref<16x326xf32, #tpu.memory_space<vmem>>, vector<16x288xf32>
    %c0_41 = arith.constant 0 : index
    %c36_42 = arith.constant 36 : index
    %38 = vector.load %arg7[%c0_41, %c36_42] : memref<16x326xf32, #tpu.memory_space<vmem>>, vector<16x288xf32>
    %c0_43 = arith.constant 0 : index
    %c37_44 = arith.constant 37 : index
    %39 = vector.load %arg7[%c0_43, %c37_44] : memref<16x326xf32, #tpu.memory_space<vmem>>, vector<16x288xf32>
    %c0_45 = arith.constant 0 : index
    %c38_46 = arith.constant 38 : index
    %40 = vector.load %arg7[%c0_45, %c38_46] : memref<16x326xf32, #tpu.memory_space<vmem>>, vector<16x288xf32>
    %41 = tpu.concatenate %32, %33, %34, %35, %36, %37, %38, %39, %40 in 0 : vector<16x288xf32>, vector<16x288xf32>, vector<16x288xf32>, vector<16x288xf32>, vector<16x288xf32>, vector<16x288xf32>, vector<16x288xf32>, vector<16x288xf32>, vector<16x288xf32> -> vector<144x288xf32>
    %c0_47 = arith.constant 0 : index
    %c0_48 = arith.constant 0 : index
    %42 = vector.load %arg4[%c0_47, %c0_48] : memref<8x144xf32, #tpu.memory_space<vmem>>, vector<8x144xf32>
    %cst_49 = arith.constant dense<0.000000e+00> : vector<8x288xf32>
    %43 = tpu.matmul %42, %41, %cst_49 {dimension_numbers = #tpu.dot_dimension_numbers<[1], [0], [0], [1], [0, 0, 1, 1], [], []>} : vector<8x144xf32>, vector<144x288xf32>, vector<8x288xf32> -> vector<8x288xf32>
    %c0_50 = arith.constant 0 : index
    %c0_51 = arith.constant 0 : index
    %c0_52 = arith.constant 0 : index
    %44 = vector.load %arg6[%c0_50, %c0_51, %c0_52] : memref<1x8x288xf32, #tpu.memory_space<vmem>>, vector<1x8x288xf32>
    %45 = vector.shape_cast %44 : vector<1x8x288xf32> to vector<8x288xf32>
    %46 = vector.shape_cast %43 : vector<8x288xf32> to vector<1x8x288xf32>
    tpu.vector_store %arg6[%c0_50, %c0_51, %c0_52], %46 {strides = array<i32>} : memref<1x8x288xf32, #tpu.memory_space<vmem>>, vector<1x8x288xf32>,
    return
  }
  func.func @transform_0(%arg0: i32) -> (i32, i32, i32) {
    %c0_i32 = arith.constant 0 : i32
    %c0_i32_0 = arith.constant 0 : i32
    %c0_i32_1 = arith.constant 0 : i32
    return %arg0, %c0_i32, %c0_i32_0 : i32, i32, i32
  }
  func.func @transform_1(%arg0: i32) -> (i32, i32) {
    %c0_i32 = arith.constant 0 : i32
    %c0_i32_0 = arith.constant 0 : i32
    %c0_i32_1 = arith.constant 0 : i32
    return %c0_i32, %c0_i32_0 : i32, i32
  }
  func.func @transform_2(%arg0: i32) -> (i32, i32) {
    %c0_i32 = arith.constant 0 : i32
    %c0_i32_0 = arith.constant 0 : i32
    %c0_i32_1 = arith.constant 0 : i32
    return %c0_i32, %c0_i32_0 : i32, i32
  }
  func.func @transform_3(%arg0: i32) -> (i32, i32) {
    %c0_i32 = arith.constant 0 : i32
    %c0_i32_0 = arith.constant 0 : i32
    %c0_i32_1 = arith.constant 0 : i32
    return %c0_i32, %c0_i32_0 : i32, i32
  }
  func.func @transform_4(%arg0: i32) -> (i32, i32) {
    %c0_i32 = arith.constant 0 : i32
    %c0_i32_0 = arith.constant 0 : i32
    %c0_i32_1 = arith.constant 0 : i32
    return %c0_i32, %c0_i32_0 : i32, i32
  }
  func.func @transform_5(%arg0: i32) -> (i32, i32, i32) {
    %c0_i32 = arith.constant 0 : i32
    %c0_i32_0 = arith.constant 0 : i32
    %c0_i32_1 = arith.constant 0 : i32
    return %arg0, %c0_i32, %c0_i32_0 : i32, i32, i32
  }
}

</mosaic_0001>

<bundles_post_ra>
// kernel: tpu_custom_call.1
= control target key start
LH: loop header
LB: loop body
LE: loop exit
PB: predicated region body
PF: predicated region fallthrough
CT: control target
= control target key end

     0   :  { %10 = vsyncpa [#allocation4], 0  ;;  %s1951_s0 = inlined_call_operand.hbm [shape: f32[2,16,362], index: 0, kind: input, shape index: {}]   ;;  %s1952_s1 = inlined_call_operand.hbm [shape: f32[16,144], index: 1, kind: input, shape index: {}]   ;;  %s1953_s2 = inlined_call_operand.vmem [shape: f32[16,1], index: 2, kind: input, shape index: {}]   ;;  %s1954_s3 = inlined_call_operand.vmem [shape: f32[8,144], index: 3, kind: input, shape index: {}]   ;;  %s1955_s4 = inlined_call_operand.vmem [shape: f32[1,324], index: 4, kind: input, shape index: {}]   ;;  %s1956_s5 = inlined_call_operand.hbm [shape: f32[2,8,288], index: 5, kind: output, shape index: {}]  }
   0x1   :  { %12 = vsyncpa [#allocation4 + $0x1], 0 }
   0x2   :  { %13 = vsyncpa [#allocation7], 0 }
   0x3   :  { %14 = vsyncpa [#allocation5], 0 }
   0x4   :  { %16 = vsyncpa [#allocation5 + $0x1], 0  ;;  %s1366_s18 = smov 0   ;;  %s1368_s19 = smov 0  }
   0x5   :  { %s1370_s20 = smov 0   ;;  %s1372_s21 = smov 0  }
   0x6 LB: > { %s1387_s22 = sadd.s32 4294967295, %s1317_s21   ;;  %s1101_s23 = sadd.s32 4294967294, %s1317_s21   ;;  %s1317_s21 = sphi %s1372_s21, %s1978_s21   ;;  %s1313_s20 = sphi %s1370_s20, %s1977_s20   ;;  %s1309_s19 = sphi %s1368_s19, %s1976_s19   ;;  %s1305_s18 = sphi %s1366_s18, %s1975_s18  }
   0x7   : > { %p42_p0 = scmp.ne.s32.totalorder %s1309_s19, %s1305_s18  ;;  %p1957_p1 = scmp.eq.s32.totalorder %s1387_s22, 0 }
   0x8   : > { %p156_p3 = scmp.eq.s32.totalorder %s1101_s23, 1  ;;  %p1102_p5 = scmp.ge.s32.totalorder %s1317_s21, 1 }
   0x9   : > { %p1396_p4 = por %p1957_p1, %p42_p0  ;;  %p163_p7 = scmp.lt.s32.totalorder %s1317_s21, 3 }
   0xa   : > { %p1401_p6 = por %p156_p3, %p42_p0  ;;  %s1319_s27 = smov [#allocation6]  }
   0xb   : > { %s1961_s24 = scalar_select %p1396_p4, 1, 0 }
   0xc   : > { %s1962_s25 = scalar_select %p1401_p6, 1, 0 }
   0xd   : > { %p1406_p8 = pnand %p1102_p5, %p163_p7  ;;  %s175_s28 = sshll.u32 %s1319_s27, 4  ;;  %s176_s28 = int_to_ptr.vmem [resolvable:$true] %s175_s28 }
   0xe   : > { %s1420_s30 = sadd.s32 1, %s1317_s21   ;;  %s29_s6 = sadd.s32 1, %s1313_s20 }
   0xf   : > { %s1963_s26 = scalar_select %p1406_p8, 1, 0 }
  0x10   : > { %p1130_p9 = pneg %p1406_p8  ;;  %s26_s7 = ssub.s32 %s1317_s21, %s1420_s30 }
  0x11   : > { %s1206_s8 = scalar_lea.vmem %s176_s28, 512  ;;  %p1214_p5 = scmp.lt.s32.totalorder %s176_s28, %s176_s28 }
  0x12   : > { %p1415_p11 = pnand %p1130_p9, %p1957_p1  ;;  %p1207_p13 = scmp.ne.s32.totalorder %s176_s28, %s1206_s8 }
  0x13   : > { %p1215_p7 = scmp.lt.s32.totalorder %s1206_s8, %s1206_s8 }
  0x14   : > { %p1197_p12 = pneg %p1415_p11 }
  0x15   : > { %p1216_p10 = por %p1215_p7, %p1214_p5 }
  0x16   : > { %p1209_p0 = pnand %p1207_p13, %p1197_p12 }
  0x18   : > { %p1210_p3 = pneg %p1209_p0 }
  0x1a   : > { %p1217_p2 = pnand %p1216_p10, %p1210_p3 }
  0x1c   : > { %1220 = shalt.err (!%p1217_p2)
}
  0x1d   : > { %s1320_s9 = smov 256   ;;  %s1321_s10 = smov 16  }
  0x1e   : > { %1133 = dma.hbm_to_vmem [thread:$0]  (!%p1415_p11), %s1952_s1, 512, %s176_s28, [#allocation7], %s1320_s9, %s1320_s9, %s1321_s10  }
  0x1f   : > { %p27_p9 = scmp.eq.s32.totalorder %s26_s7, 0  ;;  %p36_p12 = scmp.ne.s32.totalorder %s1313_s20, %s1309_s19 }
  0x20   : > { %p37_p10 = scmp.eq.s32.totalorder %s1317_s21, 0  ;;  %p1143_p2 = scmp.lt.s32.totalorder %s1317_s21, 2 }
  0x21   : > { %s1437_s13 = scalar_select %p27_p9, %s1313_s20, %s29_s6  }
  0x22   : > { %p38_p13 = por %p37_p10, %p36_p12  ;;  %p1965_p0 = scmp.eq.s32.totalorder %s1387_s22, 1 }
  0x23   : > { %s198_s15 = sand.u32 1, %s1313_s20   ;;  %s1118_s16 = smul.u32 768, %s1317_s21 }
  0x24   : > { %p1441_p3 = por %p1965_p0, %p36_p12  ;;  %s1117_s17 = smul.u32 48, %s198_s15 }
  0x25   : > { %s1450_s29 = scalar_lea.hbm %s1951_s0, %s1118_s16  ;;  %p1452_p11 = pnand %p1143_p2, %p38_p13 }
  0x26   : > { %s1966_s14 = scalar_select %p1441_p3, 1, 0 }
  0x27   : > { %s202_s6 = scalar_lea.vmem [#allocation3], %s1117_s17  ;;  %s1458_s8 = scalar_lea.sflag [#allocation4], %s198_s15 }
  0x28   : > { %s209_s7 = sshll.u32 %s202_s6, 4  ;;  %s1221_s9 = scalar_lea.hbm %s1450_s29, 768  ;;  %s1456_s7 = int_to_ptr.vmem [resolvable:$true] %s209_s7 }
  0x29   : > { %p1222_p5 = scmp.ne.s32.totalorder %s1450_s29, %s1221_s9  ;;  %p1223_p7 = pneg %p1452_p11 }
  0x2a   : > { %s1226_s12 = scalar_lea.hbm %s1951_s0, 1536  ;;  %p1227_p10 = scmp.lt.s32.totalorder %s1450_s29, %s1951_s0 }
  0x2b   : > { %p1224_p9 = pnand %p1223_p7, %p1222_p5  ;;  %p1228_p2 = scmp.lt.s32.totalorder %s1226_s12, %s1221_s9 }
  0x2d   : > { %p1225_p12 = pneg %p1224_p9  ;;  %p1229_p13 = por %p1228_p2, %p1227_p10 }
  0x2f   : > { %p1230_p0 = pnand %p1229_p13, %p1225_p12 }
  0x31   : > { %1233 = shalt.err (!%p1230_p0)
}
  0x32   : > { %s1234_s15 = scalar_lea.vmem %s1456_s7, 768  ;;  %s1322_s17 = smov [#allocation3]  }
  0x33   : > { %p1235_p1 = scmp.ne.s32.totalorder %s1456_s7, %s1234_s15  ;;  %s1239_s27 = sshll.u32 %s1322_s17, 4  ;;  %s1240_s27 = int_to_ptr.vmem [resolvable:$false] %s1239_s27 }
  0x34   : > { %s1241_s6 = scalar_lea.vmem %s1240_s27, 1536  ;;  %p1242_p9 = scmp.lt.s32.totalorder %s1456_s7, %s1240_s27 }
  0x35   : > { %p1237_p6 = pnand %p1235_p1, %p1223_p7  ;;  %p1243_p3 = scmp.lt.s32.totalorder %s1241_s6, %s1234_s15 }
  0x37   : > { %p1238_p5 = pneg %p1237_p6  ;;  %p1244_p4 = por %p1243_p3, %p1242_p9 }
  0x39   : > { %p1245_p8 = pnand %p1244_p4, %p1238_p5 }
  0x3b   : > { %1248 = shalt.err (!%p1245_p8)
}
  0x3c   : > { %s1323_s9 = smov 384   ;;  %s1324_s10 = smov 24  }
  0x3d   : > { %1137 = dma.hbm_to_vmem [thread:$0]  (!%p1452_p11), %s1450_s29, 768, %s1456_s7, %s1458_s8, %s1323_s9, %s1323_s9, %s1324_s10  }
  0x3e   : > { %p1968_p1 = scmp.ne.s32.totalorder %s1963_s26, 0 }
  0x3f   : > { %s1482_s11 = sand.u32 (!%p1968_p1), 1, %s1309_s19   ;;  %p1969_p4 = scmp.ne.s32.totalorder (!%p1968_p1), %s1961_s24, 0 }
  0x40   : > { %221 = sbr.rel (%p1968_p1) target bundleno = 908 (0x38c), region = 40  ;;  %s224_s16 = scalar_lea.sflag (!%p1968_p1), [#allocation4], %s1482_s11 }
  0x41   : > { %s1119_s12 = smul.u32 (!%p1968_p1), 48, %s1482_s11 }
  0x43   : > { %s227_s23 = scalar_lea.vmem (!%p1968_p1), [#allocation3], %s1119_s12 }
  0x45   : > { %1292 = dma.done.wait (%p1969_p4), %s224_s16, 768  }
  0x46   : > { %1294 = vsyncadd (%p1969_p4), %s224_s16, 4294966528  ;;  %p1970_p6 = scmp.eq.s32.totalorder %s1387_s22, 0 }
  0x48   : > { %1296 = dma.done.wait (%p1970_p6), [#allocation7], 512   ;;  %p1971_p8 = pmov %p1970_p6 }
  0x49   : > { %v1325_v0 = vmov 0.0   ;;  %v1495_v1 = vld [vmem:[%s227_s23 + $0x20] sm:$0xff]  ;;  %v1497_v2 = vld [vmem:[%s227_s23 + $0x18] sm:$0xff]  ;;  %s1326_s26 = smov 91   ;;  %v1503_v3 = vld [vmem:[%s227_s23 + $0x28] sm:$0xff]  ;;  %s1327_s24 = smov 92  }
  0x4a   : > { %1298 = vsyncadd (%p1971_p8), [#allocation7], 4294966784  ;;  %554 = vmatprep.subr.mxu1 %v1325_v0  ;;  %416 = vrot.lane.b32.xlu0 %v1495_v1, %s1326_s26  ;;  %v1505_v4 = vld [vmem:[%s227_s23 + $0x8] sm:$0xff]  ;;  %v1511_v5 = vld [vmem:[%s227_s23 + $0x10] sm:$0xff]  ;;  %s1328_s29 = smov 108   ;;  %s1329_s28 = smov 109  }
  0x4b   : > { %414 = vrot.lane.b32.xlu1 %v1497_v2, %s1326_s26  ;;  %v1513_v6 = vld [vmem:[%s227_s23] sm:$0xff]  ;;  %s1330_s7 = smov 110   ;;  %s1331_s8 = smov 126   ;;  %v455_v7 = vld [vmem:[#allocation6 + $0x8] sm:$0xff]  ;;  %vm470_vm0 = vcmask 130048   ;;  %v1334_v8 = vmov 0  }
  0x4c   : > { %s1332_s15 = smov 127   ;;  %1110 = vmatprep.mubr.msk.f32.mxu1 %vm470_vm0, %v455_v7  ;;  %1108 = vmatprep.mubr.msk.f32.mxu0 %vm470_vm0, %v455_v7  ;;  %s1333_s17 = smov 90   ;;  %v458_v9 = vld [vmem:[%s1953_s2] sm:$0xff]  ;;  %v459_v10 = vld [vmem:[%s1953_s2 + $0x8] sm:$0xff]  ;;  %vm420_vm1 = vcmask 744448   ;;  %vm397_vm2 = vcmask 752640  }
  0x4d   : > { %1194 = vset.pattern.permute.xlu1 %v1334_v8  ;;  %1193 = vset.pattern.permute.xlu0 %v1334_v8  ;;  %vm374_vm3 = vcmask 883712   ;;  %vm351_vm4 = vcmask 891904   ;;  %vm328_vm5 = vcmask 900096   ;;  %vm305_vm6 = vcmask 1031168   ;;  %s1007_s9 = scalar_lea.sflag [#allocation5], %s1482_s11  ;;  %p1972_p11 = scmp.ne.s32.totalorder %s1966_s14, 0 }
  0x4e   : > { %418 = vrot.lane.b32.xlu0 %v1503_v3, %s1326_s26  ;;  %vm282_vm7 = vcmask 1039360   ;;  %vm443_vm8 = vcmask 736256   ;;  %vm660_vm9 = vcmask 556032   ;;  %vm665_vm10 = vcmask 572960  }
  0x4f   : > { %410 = vrot.lane.b32.xlu1 %v1505_v4, %s1326_s26  ;;  %vm1004_vm11 = vcmask 261120  }
  0x52   : > { %412 = vrot.lane.b32.xlu0 %v1511_v5, %s1326_s26 }
  0x53   : > { %408 = vrot.lane.b32.xlu1 %v1513_v6, %s1326_s26 }
  0x56   : > { %393 = vrot.lane.b32.xlu0 %v1495_v1, %s1327_s24 }
  0x57   : > { %395 = vrot.lane.b32.xlu1 %v1503_v3, %s1327_s24 }
  0x5a   : > { %391 = vrot.lane.b32.xlu0 %v1497_v2, %s1327_s24 }
  0x5b   : > { %387 = vrot.lane.b32.xlu1 %v1505_v4, %s1327_s24 }
  0x5e   : > { %389 = vrot.lane.b32.xlu0 %v1511_v5, %s1327_s24 }
  0x5f   : > { %385 = vrot.lane.b32.xlu1 %v1513_v6, %s1327_s24 }
  0x62   : > { %370 = vrot.lane.b32.xlu0 %v1495_v1, %s1328_s29 }
  0x63   : > { %372 = vrot.lane.b32.xlu1 %v1503_v3, %s1328_s29 }
  0x66   : > { %368 = vrot.lane.b32.xlu0 %v1497_v2, %s1328_s29 }
  0x67   : > { %364 = vrot.lane.b32.xlu1 %v1505_v4, %s1328_s29 }
  0x6a   : > { %366 = vrot.lane.b32.xlu0 %v1511_v5, %s1328_s29 }
  0x6b   : > { %362 = vrot.lane.b32.xlu1 %v1513_v6, %s1328_s29 }
  0x6e   : > { %347 = vrot.lane.b32.xlu0 %v1495_v1, %s1329_s28 }
  0x6f   : > { %349 = vrot.lane.b32.xlu1 %v1503_v3, %s1329_s28 }
  0x72   : > { %345 = vrot.lane.b32.xlu0 %v1497_v2, %s1329_s28 }
  0x73   : > { %341 = vrot.lane.b32.xlu1 %v1505_v4, %s1329_s28 }
  0x76   : > { %343 = vrot.lane.b32.xlu0 %v1511_v5, %s1329_s28 }
  0x77   : > { %339 = vrot.lane.b32.xlu1 %v1513_v6, %s1329_s28 }
  0x7a   : > { %324 = vrot.lane.b32.xlu0 %v1495_v1, %s1330_s7 }
  0x7b   : > { %326 = vrot.lane.b32.xlu1 %v1503_v3, %s1330_s7 }
  0x7e   : > { %322 = vrot.lane.b32.xlu0 %v1497_v2, %s1330_s7 }
  0x7f   : > { %318 = vrot.lane.b32.xlu1 %v1505_v4, %s1330_s7 }
  0x82   : > { %320 = vrot.lane.b32.xlu0 %v1511_v5, %s1330_s7 }
  0x83   : > { %316 = vrot.lane.b32.xlu1 %v1513_v6, %s1330_s7 }
  0x86   : > { %301 = vrot.lane.b32.xlu0 %v1495_v1, %s1331_s8 }
  0x87   : > { %303 = vrot.lane.b32.xlu1 %v1503_v3, %s1331_s8 }
  0x8a   : > { %299 = vrot.lane.b32.xlu0 %v1497_v2, %s1331_s8 }
  0x8b   : > { %295 = vrot.lane.b32.xlu1 %v1505_v4, %s1331_s8 }
  0x8e   : > { %297 = vrot.lane.b32.xlu0 %v1511_v5, %s1331_s8 }
  0x8f   : > { %293 = vrot.lane.b32.xlu1 %v1513_v6, %s1331_s8 }
  0x92   : > { %278 = vrot.lane.b32.xlu0 %v1495_v1, %s1332_s15 }
  0x93   : > { %280 = vrot.lane.b32.xlu1 %v1503_v3, %s1332_s15 }
  0x96   : > { %276 = vrot.lane.b32.xlu0 %v1497_v2, %s1332_s15 }
  0x97   : > { %272 = vrot.lane.b32.xlu1 %v1505_v4, %s1332_s15 }
  0x9a   : > { %274 = vrot.lane.b32.xlu0 %v1511_v5, %s1332_s15 }
  0x9b   : > { %270 = vrot.lane.b32.xlu1 %v1513_v6, %s1332_s15 }
  0x9e   : > { %439 = vrot.lane.b32.xlu0 %v1495_v1, %s1333_s17 }
  0x9f   : > { %441 = vrot.lane.b32.xlu1 %v1503_v3, %s1333_s17 }
  0xa2   : > { %437 = vrot.lane.b32.xlu0 %v1497_v2, %s1333_s17 }
  0xa3   : > { %433 = vrot.lane.b32.xlu1 %v1505_v4, %s1333_s17 }
  0xa6   : > { %435 = vrot.lane.b32.xlu0 %v1511_v5, %s1333_s17 }
  0xa7   : > { %431 = vrot.lane.b32.xlu1 %v1513_v6, %s1333_s17 }
  0xaa   : > { %467 = vperm.xlu0 %1193, %v459_v10  }
  0xab   : > { %462 = vperm.xlu1 %1194, %v458_v9  }
  0xbc   : > { %v417_v11 = vpop.permute.xlu0 %416 }
  0xbd   : > { %v415_v12 = vpop.permute.xlu1 %414 }
  0xbe   : > { %v423_v16 = vsel %vm420_vm1, %v415_v12, %v417_v11 }
  0xc0   : > { %v419_v13 = vpop.permute.xlu0 %418 }
  0xc1   : > { %v411_v14 = vpop.permute.xlu1 %410  ;;  %555 = vmatpush1.msra.mxu1 %v419_v13  ;;  %v424_v15 = vsel %vm420_vm1, %v417_v11, %v419_v13 }
  0xc2   : > { %477 = vmatprep.subr.mxu0 %v424_v15  ;;  %556 = vmatprep.subr.mxu1 %v1325_v0 }
  0xc3   : > { %478 = vmatpush1.msra.mxu0 %v423_v16 }
  0xc4   : > { %v413_v17 = vpop.permute.xlu0 %412 }
  0xc5   : > { %v409_v18 = vpop.permute.xlu1 %408  ;;  %557 = vmatpush1.msra.mxu1 %v413_v17  ;;  %v422_v19 = vsel %vm420_vm1, %v411_v14, %v413_v17 }
  0xc6   : > { %v421_v20 = vsel %vm420_vm1, %v409_v18, %v411_v14  ;;  %479 = vmatprep.subr.mxu0 %v422_v19  ;;  %558 = vmatprep.subr.mxu1 %v1325_v0 }
  0xc7   : > { %480 = vmatpush1.msra.mxu0 %v421_v20 }
  0xc8   : > { %v394_v21 = vpop.permute.xlu0 %393 }
  0xc9   : > { %v396_v22 = vpop.permute.xlu1 %395 }
  0xca   : > { %v401_v23 = vsel %vm397_vm2, %v394_v21, %v396_v22  ;;  %559 = vmatpush1.msra.mxu1 %v396_v22 }
  0xcb   : > { %481 = vmatprep.subr.mxu0 %v401_v23  ;;  %560 = vmatprep.subr.mxu1 %v1325_v0 }
  0xcc   : > { %v392_v24 = vpop.permute.xlu0 %391 }
  0xcd   : > { %v388_v25 = vpop.permute.xlu1 %387  ;;  %v400_v26 = vsel %vm397_vm2, %v392_v24, %v394_v21 }
  0xce   : > { %482 = vmatpush1.msra.mxu0 %v400_v26 }
  0xd0   : > { %v390_v27 = vpop.permute.xlu0 %389 }
  0xd1   : > { %v386_v28 = vpop.permute.xlu1 %385  ;;  %561 = vmatpush1.msra.mxu1 %v390_v27  ;;  %v399_v29 = vsel %vm397_vm2, %v388_v25, %v390_v27 }
  0xd2   : > { %v398_v30 = vsel %vm397_vm2, %v386_v28, %v388_v25  ;;  %483 = vmatprep.subr.mxu0 %v399_v29  ;;  %562 = vmatprep.subr.mxu1 %v1325_v0 }
  0xd3   : > { %484 = vmatpush1.msra.mxu0 %v398_v30  ;;  %v456_v30 = vld [vmem:[#allocation6 + $0x10] sm:$0xff] }
  0xd4   : > { %v371_v31 = vpop.permute.xlu0 %370 }
  0xd5   : > { %v373_v32 = vpop.permute.xlu1 %372 }
  0xd6   : > { %v378_v33 = vsel %vm374_vm3, %v371_v31, %v373_v32  ;;  %563 = vmatpush1.msra.mxu1 %v373_v32 }
  0xd7   : > { %485 = vmatprep.subr.mxu0 %v378_v33  ;;  %564 = vmatprep.subr.mxu1 %v1325_v0 }
  0xd8   : > { %v369_v34 = vpop.permute.xlu0 %368 }
  0xd9   : > { %v365_v35 = vpop.permute.xlu1 %364  ;;  %v377_v36 = vsel %vm374_vm3, %v369_v34, %v371_v31  ;;  %v637_v31 = vlaneseq  ;;  %v635_v34 = vld [vmem:[%s1955_s4] sm:$0x7] }
  0xda   : > { %486 = vmatpush1.msra.mxu0 %v377_v36 }
  0xdb   : > { %v638_v32 = vshrl.u32 %v637_v31, 7 }
  0xdc   : > { %v367_v37 = vpop.permute.xlu0 %366 }
  0xdd   : > { %v363_v38 = vpop.permute.xlu1 %362  ;;  %565 = vmatpush1.msra.mxu1 %v367_v37  ;;  %v376_v39 = vsel %vm374_vm3, %v365_v35, %v367_v37  ;;  %v647_v33 = vsub.s32 2, %v638_v32  ;;  %v639_v36 = vsub.s32 0, %v638_v32 }
  0xde   : > { %v375_v40 = vsel %vm374_vm3, %v363_v38, %v365_v35  ;;  %487 = vmatprep.subr.mxu0 %v376_v39  ;;  %566 = vmatprep.subr.mxu1 %v1325_v0  ;;  %v643_v38 = vsub.s32 1, %v638_v32 }
  0xdf   : > { %488 = vmatpush1.msra.mxu0 %v375_v40  ;;  %v648_v39 = vrot.slane %v635_v34, %v647_v33 }
  0xe0   : > { %v348_v41 = vpop.permute.xlu0 %347 }
  0xe1   : > { %v350_v42 = vpop.permute.xlu1 %349 }
  0xe2   : > { %v355_v43 = vsel %vm351_vm4, %v348_v41, %v350_v42  ;;  %567 = vmatpush1.msra.mxu1 %v350_v42 }
  0xe3   : > { %489 = vmatprep.subr.mxu0 %v355_v43  ;;  %568 = vmatprep.subr.mxu1 %v1325_v0 }
  0xe4   : > { %v346_v44 = vpop.permute.xlu0 %345 }
  0xe5   : > { %v342_v45 = vpop.permute.xlu1 %341  ;;  %v354_v46 = vsel %vm351_vm4, %v346_v44, %v348_v41 }
  0xe6   : > { %490 = vmatpush1.msra.mxu0 %v354_v46  ;;  %v640_v46 = vrot.slane %v635_v34, %v639_v36 }
  0xe8   : > { %v344_v47 = vpop.permute.xlu0 %343 }
  0xe9   : > { %v340_v48 = vpop.permute.xlu1 %339  ;;  %569 = vmatpush1.msra.mxu1 %v344_v47  ;;  %v353_v49 = vsel %vm351_vm4, %v342_v45, %v344_v47 }
  0xea   : > { %v352_v50 = vsel %vm351_vm4, %v340_v48, %v342_v45  ;;  %491 = vmatprep.subr.mxu0 %v353_v49  ;;  %570 = vmatprep.subr.mxu1 %v1325_v0  ;;  %v644_v48 = vrot.slane %v635_v34, %v643_v38 }
  0xeb   : > { %492 = vmatpush1.msra.mxu0 %v352_v50 }
  0xec   : > { %v325_v51 = vpop.permute.xlu0 %324 }
  0xed   : > { %v327_v52 = vpop.permute.xlu1 %326 }
  0xee   : > { %v332_v53 = vsel %vm328_vm5, %v325_v51, %v327_v52  ;;  %571 = vmatpush1.msra.mxu1 %v327_v52 }
  0xef   : > { %493 = vmatprep.subr.mxu0 %v332_v53  ;;  %572 = vmatprep.subr.mxu1 %v1325_v0 }
  0xf0   : > { %v323_v54 = vpop.permute.xlu0 %322 }
  0xf1   : > { %v319_v55 = vpop.permute.xlu1 %318  ;;  %v331_v56 = vsel %vm328_vm5, %v323_v54, %v325_v51 }
  0xf2   : > { %494 = vmatpush1.msra.mxu0 %v331_v56 }
  0xf4   : > { %v321_v57 = vpop.permute.xlu0 %320 }
  0xf5   : > { %v317_v58 = vpop.permute.xlu1 %316  ;;  %573 = vmatpush1.msra.mxu1 %v321_v57  ;;  %v330_v59 = vsel %vm328_vm5, %v319_v55, %v321_v57 }
  0xf6   : > { %v329_v60 = vsel %vm328_vm5, %v317_v58, %v319_v55  ;;  %495 = vmatprep.subr.mxu0 %v330_v59  ;;  %574 = vmatprep.subr.mxu1 %v1325_v0 }
  0xf7   : > { %496 = vmatpush1.msra.mxu0 %v329_v60 }
  0xf8   : > { %v302_v61 = vpop.permute.xlu0 %301 }
  0xf9   : > { %v304_v62 = vpop.permute.xlu1 %303 }
  0xfa   : > { %v309_v63 = vsel %vm305_vm6, %v302_v61, %v304_v62  ;;  %575 = vmatpush1.msra.mxu1 %v304_v62 }
  0xfb   : > { %497 = vmatprep.subr.mxu0 %v309_v63  ;;  %576 = vmatprep.subr.mxu1 %v1325_v0 }
  0xfc   : > { %v300_v7 = vpop.permute.xlu0 %299 }
  0xfd   : > { %v296_v8 = vpop.permute.xlu1 %295  ;;  %v308_v9 = vsel %vm305_vm6, %v300_v7, %v302_v61 }
  0xfe   : > { %498 = vmatpush1.msra.mxu0 %v308_v9 }
 0x100   : > { %v298_v10 = vpop.permute.xlu0 %297 }
 0x101   : > { %v294_v11 = vpop.permute.xlu1 %293  ;;  %577 = vmatpush1.msra.mxu1 %v298_v10  ;;  %v307_v12 = vsel %vm305_vm6, %v296_v8, %v298_v10 }
 0x102   : > { %v306_v13 = vsel %vm305_vm6, %v294_v11, %v296_v8  ;;  %499 = vmatprep.subr.mxu0 %v307_v12  ;;  %578 = vmatprep.subr.mxu1 %v1325_v0 }
 0x103   : > { %500 = vmatpush1.msra.mxu0 %v306_v13  ;;  %v857_v13 = vld [vmem:[%s1954_s3 + $0x8] sm:$0xff] }
 0x104   : > { %v279_v14 = vpop.permute.xlu0 %278 }
 0x105   : > { %v281_v15 = vpop.permute.xlu1 %280 }
 0x106   : > { %v286_v16 = vsel %vm282_vm7, %v279_v14, %v281_v15  ;;  %579 = vmatpush1.msra.mxu1 %v281_v15 }
 0x107   : > { %501 = vmatprep.subr.mxu0 %v286_v16  ;;  %580 = vmatprep.subr.mxu1 %v1325_v0 }
 0x108   : > { %v277_v17 = vpop.permute.xlu0 %276 }
 0x109   : > { %v273_v18 = vpop.permute.xlu1 %272  ;;  %v285_v19 = vsel %vm282_vm7, %v277_v17, %v279_v14 }
 0x10a   : > { %502 = vmatpush1.msra.mxu0 %v285_v19 }
 0x10c   : > { %v275_v20 = vpop.permute.xlu0 %274 }
 0x10d   : > { %v271_v21 = vpop.permute.xlu1 %270  ;;  %581 = vmatpush1.msra.mxu1 %v275_v20  ;;  %v284_v22 = vsel %vm282_vm7, %v273_v18, %v275_v20 }
 0x10e   : > { %v283_v23 = vsel %vm282_vm7, %v271_v21, %v273_v18  ;;  %503 = vmatprep.subr.mxu0 %v284_v22  ;;  %582 = vmatprep.subr.mxu1 %v1325_v0 }
 0x10f   : > { %504 = vmatpush1.msra.mxu0 %v283_v23  ;;  %583 = vmatpush1.msra.mxu1 %v1503_v3 }
 0x110   : > { %v440_v24 = vpop.permute.xlu0 %439  ;;  %505 = vmatprep.subr.mxu0 %v1495_v1  ;;  %584 = vmatprep.subr.mxu1 %v1325_v0 }
 0x111   : > { %v442_v25 = vpop.permute.xlu1 %441  ;;  %506 = vmatpush1.msra.mxu0 %v1497_v2  ;;  %585 = vmatpush1.msra.mxu1 %v1511_v5  ;;  %v454_v2 = vld [vmem:[#allocation6] sm:$0xff] }
 0x112   : > { %507 = vmatprep.subr.mxu0 %v1505_v4  ;;  %614 = vmatprep.subr.mxu1 %v1325_v0  ;;  %v447_v3 = vsel %vm443_vm8, %v440_v24, %v442_v25 }
 0x113   : > { %508 = vmatpush1.msra.mxu0 %v1513_v6  ;;  %615 = vmatpush2.msra.mxu1 %v442_v25  ;;  %v457_v6 = vld [vmem:[#allocation6 + $0x18] sm:$0xff] }
 0x114   : > { %v438_v26 = vpop.permute.xlu0 %437  ;;  %537 = vmatprep.subr.mxu0 %v447_v3  ;;  %616 = vmatprep.subr.mxu1 %v1325_v0 }
 0x115   : > { %v434_v1 = vpop.permute.xlu1 %433  ;;  %v446_v27 = vsel %vm443_vm8, %v438_v26, %v440_v24 }
 0x116   : > { %538 = vmatpush2.msra.mxu0 %v446_v27 }
 0x118   : > { %v436_v28 = vpop.permute.xlu0 %435 }
 0x119   : > { %v432_v5 = vpop.permute.xlu1 %431  ;;  %617 = vmatpush2.msra.mxu1 %v436_v28  ;;  %v445_v4 = vsel %vm443_vm8, %v434_v1, %v436_v28 }
 0x11a   : > { %v444_v29 = vsel %vm443_vm8, %v432_v5, %v434_v1  ;;  %539 = vmatprep.subr.mxu0 %v445_v4  ;;  %619 = vmatmul.mubr.f32.vlgmr.msra.gmra.mxu1 %v454_v2 }
 0x11b   : > { %540 = vmatpush2.msra.mxu0 %v444_v29  ;;  %1111 = vmatprep.mubr.msk.f32.mxu1 %vm470_vm0, %v457_v6 }
 0x11c   : > { %542 = vmatmul.mubr.f32.vlgmr.msra.gmra.mxu0 %v454_v2  ;;  %932 = vmatprep.subr.mxu1 %v1325_v0 }
 0x11d   : > { %1109 = vmatprep.mubr.msk.f32.mxu0 %vm470_vm0, %v457_v6 }
 0x11e   : > { %624 = vmatmul.mubr.f32.gmra.mxu1 %v456_v30 }
 0x11f   : > { %1113 = vmatprep.mubr.msk.f32.mxu1 %vm470_vm0, %v857_v13 }
 0x120   : > { %548 = vmatmul.mubr.f32.gmra.mxu0 %v456_v30 }
 0x121   : > { %1112 = vmatprep.mubr.msk.f32.mxu0 %vm470_vm0, %v857_v13 }
 0x125   : > { %v468_v41 = vpop.permute.xlu0 %467 }
 0x126   : > { %v463_v35 = vpop.permute.xlu1 %462 }
 0x1da   : > { %v620_v37 = vpop.f32.mrf.mxu1 }
 0x1db   : > { %v621_v40 = vadd.f32 %v620_v37, %v463_v35 }
 0x1dc   : > { %v543_v42 = vpop.f32.mrf.mxu0  ;;  %v622_v43 = vpop.f32.mrf.mxu1 }
 0x1dd   : > { %v631_v44 = vmax.f32 %v621_v40, 0.0  ;;  %v544_v45 = vadd.f32 %v543_v42, %v463_v35 }
 0x1de   : > { %v545_v47 = vpop.f32.mrf.mxu0  ;;  %v625_v49 = vpop.f32.mrf.mxu1 }
 0x1df   : > { %v654_v50 = vmul.f32 %v648_v39, %v631_v44  ;;  %v629_v51 = vmax.f32 %v544_v45, 0.0  ;;  %v546_v52 = vadd.f32 %v545_v47, %v463_v35  ;;  %v626_v53 = vadd.f32 %v625_v49, %v468_v41 }
 0x1e0   : > { %v549_v54 = vpop.f32.mrf.mxu0  ;;  %v627_v55 = vpop.f32.mrf.mxu1 }
 0x1e1   : > { %661 = vst.msk [vmem:[#allocation2 + $0x10] sm:$0xff] %vm660_vm9, %v654_v50  ;;  %v1673_v56 = vmul.f32 %v640_v46, %v629_v51  ;;  %v630_v57 = vmax.f32 %v546_v52, 0.0  ;;  %v550_v58 = vadd.f32 %v549_v54, %v468_v41  ;;  %v634_v59 = vmax.f32 %v626_v53, 0.0 }
 0x1e2   : > { %666 = vst.msk [vmem:[#allocation2 + $0x10] sm:$0xff] %vm665_vm10, %v1325_v0  ;;  %v551_v60 = vpop.f32.mrf.mxu0 }
 0x1e3   : > { %v1677_v61 = vmul.f32 %v644_v48, %v630_v57  ;;  %812 = vrot.lane.b32.xlu0 %v1673_v56, %s1326_s26  ;;  %v632_v62 = vmax.f32 %v550_v58, 0.0  ;;  %v552_v63 = vadd.f32 %v551_v60, %v468_v41  ;;  %v657_v7 = vmul.f32 %v648_v39, %v634_v59 }
 0x1e5   : > { %v1681_v8 = vmul.f32 %v640_v46, %v632_v62  ;;  %v633_v9 = vmax.f32 %v552_v63, 0.0  ;;  %664 = vst.msk [vmem:[#allocation2 + $0x28] sm:$0xff] %vm660_vm9, %v657_v7 }
 0x1e6   : > { %667 = vst.msk [vmem:[#allocation2 + $0x28] sm:$0xff] %vm665_vm10, %v1325_v0 }
 0x1e7   : > { %790 = vrot.lane.b32.xlu0 %v1673_v56, %s1327_s24  ;;  %v1688_v10 = vmul.f32 %v644_v48, %v633_v9 }
 0x1e9   : > { %v1690_v11 = vld [vmem:[#allocation2 + $0x10] sm:$0xff] }
 0x1ea   : > { %816 = vrot.lane.b32.xlu1 %v1690_v11, %s1326_s26 }
 0x1eb   : > { %768 = vrot.lane.b32.xlu0 %v1673_v56, %s1328_s29 }
 0x1ed   : > { %v1740_v12 = vld [vmem:[#allocation2 + $0x28] sm:$0xff] }
 0x1ee   : > { %794 = vrot.lane.b32.xlu1 %v1690_v11, %s1327_s24 }
 0x1ef   : > { %746 = vrot.lane.b32.xlu0 %v1673_v56, %s1329_s28 }
 0x1f2   : > { %772 = vrot.lane.b32.xlu1 %v1690_v11, %s1328_s29 }
 0x1f3   : > { %724 = vrot.lane.b32.xlu0 %v1673_v56, %s1330_s7 }
 0x1f6   : > { %750 = vrot.lane.b32.xlu1 %v1690_v11, %s1329_s28 }
 0x1f7   : > { %702 = vrot.lane.b32.xlu0 %v1673_v56, %s1331_s8 }
 0x1fa   : > { %728 = vrot.lane.b32.xlu1 %v1690_v11, %s1330_s7 }
 0x1fb   : > { %680 = vrot.lane.b32.xlu0 %v1673_v56, %s1332_s15 }
 0x1fe   : > { %706 = vrot.lane.b32.xlu1 %v1690_v11, %s1331_s8 }
 0x1ff   : > { %814 = vrot.lane.b32.xlu0 %v1677_v61, %s1326_s26 }
 0x202   : > { %684 = vrot.lane.b32.xlu1 %v1690_v11, %s1332_s15 }
 0x203   : > { %792 = vrot.lane.b32.xlu0 %v1677_v61, %s1327_s24 }
 0x206   : > { %818 = vrot.lane.b32.xlu1 %v1681_v8, %s1326_s26 }
 0x207   : > { %770 = vrot.lane.b32.xlu0 %v1677_v61, %s1328_s29 }
 0x20a   : > { %796 = vrot.lane.b32.xlu1 %v1681_v8, %s1327_s24 }
 0x20b   : > { %748 = vrot.lane.b32.xlu0 %v1677_v61, %s1329_s28 }
 0x20e   : > { %774 = vrot.lane.b32.xlu1 %v1681_v8, %s1328_s29 }
 0x20f   : > { %726 = vrot.lane.b32.xlu0 %v1677_v61, %s1330_s7 }
 0x212   : > { %752 = vrot.lane.b32.xlu1 %v1681_v8, %s1329_s28 }
 0x213   : > { %704 = vrot.lane.b32.xlu0 %v1677_v61, %s1331_s8 }
 0x216   : > { %730 = vrot.lane.b32.xlu1 %v1681_v8, %s1330_s7 }
 0x217   : > { %682 = vrot.lane.b32.xlu0 %v1677_v61, %s1332_s15 }
 0x21a   : > { %708 = vrot.lane.b32.xlu1 %v1681_v8, %s1331_s8 }
 0x21b   : > { %822 = vrot.lane.b32.xlu0 %v1740_v12, %s1326_s26 }
 0x21e   : > { %686 = vrot.lane.b32.xlu1 %v1681_v8, %s1332_s15 }
 0x21f   : > { %800 = vrot.lane.b32.xlu0 %v1740_v12, %s1327_s24 }
 0x222   : > { %820 = vrot.lane.b32.xlu1 %v1688_v10, %s1326_s26 }
 0x223   : > { %778 = vrot.lane.b32.xlu0 %v1740_v12, %s1328_s29 }
 0x226   : > { %798 = vrot.lane.b32.xlu1 %v1688_v10, %s1327_s24 }
 0x227   : > { %756 = vrot.lane.b32.xlu0 %v1740_v12, %s1329_s28 }
 0x22a   : > { %776 = vrot.lane.b32.xlu1 %v1688_v10, %s1328_s29 }
 0x22b   : > { %734 = vrot.lane.b32.xlu0 %v1740_v12, %s1330_s7 }
 0x22e   : > { %754 = vrot.lane.b32.xlu1 %v1688_v10, %s1329_s28  ;;  %s1120_s28 = smul.u32 24, %s1482_s11 }
 0x22f   : > { %712 = vrot.lane.b32.xlu0 %v1740_v12, %s1331_s8 }
 0x232   : > { %732 = vrot.lane.b32.xlu1 %v1688_v10, %s1330_s7  ;;  %s257_s7 = scalar_lea.vmem [#allocation8], %s1120_s28 }
 0x233   : > { %690 = vrot.lane.b32.xlu0 %v1740_v12, %s1332_s15 }
 0x236   : > { %710 = vrot.lane.b32.xlu1 %v1688_v10, %s1331_s8  ;;  %s1021_s8 = sshll.u32 %s257_s7, 4  ;;  %s1911_s8 = int_to_ptr.vmem [resolvable:$true] %s1021_s8 }
 0x237   : > { %844 = vrot.lane.b32.xlu0 %v1740_v12, %s1333_s17  ;;  %s1249_s10 = scalar_lea.vmem %s1911_s8, 384 }
 0x238   : > { %p1250_p3 = scmp.ne.s32.totalorder %s1911_s8, %s1249_s10 }
 0x23a   : > { %688 = vrot.lane.b32.xlu1 %v1688_v10, %s1332_s15  ;;  %s1121_s15 = smul.u32 384, %s1387_s22  ;;  %p1251_p7 = pnand %p1250_p3, %p1972_p11 }
 0x23b   : > { %836 = vrot.lane.b32.xlu0 %v1677_v61, %s1333_s17  ;;  %s1335_s22 = smov [#allocation8]  }
 0x23c   : > { %s1019_s6 = scalar_lea.hbm %s1956_s5, %s1121_s15  ;;  %p1252_p12 = pneg %p1251_p7 }
 0x23d   : > { %s1253_s12 = sshll.u32 %s1335_s22, 4  ;;  %s1254_s12 = int_to_ptr.vmem [resolvable:$false] %s1253_s12 }
 0x23e   : > { %840 = vrot.lane.b32.xlu1 %v1681_v8, %s1333_s17  ;;  %s1255_s16 = scalar_lea.vmem %s1254_s12, 768  ;;  %p1256_p10 = scmp.lt.s32.totalorder %s1911_s8, %s1254_s12 }
 0x23f   : > { %834 = vrot.lane.b32.xlu0 %v1673_v56, %s1333_s17  ;;  %p1257_p2 = scmp.lt.s32.totalorder %s1255_s16, %s1249_s10 }
 0x241   : > { %p1258_p13 = por %p1257_p2, %p1256_p10 }
 0x242   : > { %842 = vrot.lane.b32.xlu1 %v1688_v10, %s1333_s17 }
 0x243   : > { %p1259_p0 = pnand %p1258_p13, %p1252_p12 }
 0x246   : > { %838 = vrot.lane.b32.xlu1 %v1690_v11, %s1333_s17 }
 0x255   : > { %v813_v14 = vpop.permute.xlu0 %812 }
 0x259   : > { %v791_v15 = vpop.permute.xlu0 %790 }
 0x25c   : > { %v817_v16 = vpop.permute.xlu1 %816 }
 0x25d   : > { %v1791_v17 = vpop.permute.xlu0 %768 }
 0x260   : > { %v795_v18 = vpop.permute.xlu1 %794 }
 0x261   : > { %v1793_v19 = vpop.permute.xlu0 %746 }
 0x264   : > { %v1795_v20 = vpop.permute.xlu1 %772 }
 0x265   : > { %v1797_v21 = vpop.permute.xlu0 %724 }
 0x268   : > { %v1799_v22 = vpop.permute.xlu1 %750 }
 0x269   : > { %v1801_v23 = vpop.permute.xlu0 %702 }
 0x26c   : > { %v1803_v24 = vpop.permute.xlu1 %728 }
 0x26d   : > { %v1805_v25 = vpop.permute.xlu0 %680 }
 0x270   : > { %v1807_v3 = vpop.permute.xlu1 %706 }
 0x271   : > { %v815_v26 = vpop.permute.xlu0 %814 }
 0x272   : > { %v825_v42 = vsel %vm420_vm1, %v815_v26, %v817_v16  ;;  %v824_v43 = vsel %vm420_vm1, %v813_v14, %v815_v26 }
 0x274   : > { %v1809_v1 = vpop.permute.xlu1 %684 }
 0x275   : > { %v793_v27 = vpop.permute.xlu0 %792 }
 0x276   : > { %v803_v48 = vsel %vm397_vm2, %v793_v27, %v795_v18  ;;  %v802_v49 = vsel %vm397_vm2, %v791_v15, %v793_v27 }
 0x278   : > { %v819_v2 = vpop.permute.xlu1 %818 }
 0x279   : > { %v771_v28 = vpop.permute.xlu0 %770 }
 0x27a   : > { %v781_v54 = vsel %vm374_vm3, %v771_v28, %v1795_v20  ;;  %v780_v55 = vsel %vm374_vm3, %v1791_v17, %v771_v28 }
 0x27c   : > { %v797_v5 = vpop.permute.xlu1 %796 }
 0x27d   : > { %v1811_v4 = vpop.permute.xlu0 %748 }
 0x27e   : > { %v759_v62 = vsel %vm351_vm4, %v1811_v4, %v1799_v22  ;;  %v758_v63 = vsel %vm351_vm4, %v1793_v19, %v1811_v4 }
 0x280   : > { %v775_v29 = vpop.permute.xlu1 %774 }
 0x281   : > { %v1813_v6 = vpop.permute.xlu0 %726 }
 0x282   : > { %v737_v15 = vsel %vm328_vm5, %v1813_v6, %v1803_v24 }
 0x284   : > { %v753_v30 = vpop.permute.xlu1 %752 }
 0x285   : > { %v1815_v31 = vpop.permute.xlu0 %704 }
 0x288   : > { %v1817_v32 = vpop.permute.xlu1 %730 }
 0x289   : > { %v1819_v33 = vpop.permute.xlu0 %682 }
 0x28c   : > { %v1821_v34 = vpop.permute.xlu1 %708 }
 0x28d   : > { %v823_v35 = vpop.permute.xlu0 %822 }
 0x28e   : > { %933 = vmatpush1.msra.mxu1 %v823_v35 }
 0x28f   : > { %934 = vmatprep.subr.mxu1 %v1325_v0 }
 0x290   : > { %v1824_v36 = vpop.permute.xlu1 %686  ;;  %935 = vmatpush1.msra.mxu1 %v817_v16  ;;  %v736_v16 = vsel %vm328_vm5, %v1797_v21, %v1813_v6 }
 0x291   : > { %936 = vmatprep.subr.mxu1 %v1325_v0  ;;  %v801_v37 = vpop.permute.xlu0 %800 }
 0x292   : > { %937 = vmatpush1.msra.mxu1 %v801_v37 }
 0x293   : > { %938 = vmatprep.subr.mxu1 %v1325_v0 }
 0x294   : > { %v821_v38 = vpop.permute.xlu1 %820  ;;  %939 = vmatpush1.msra.mxu1 %v795_v18 }
 0x295   : > { %v826_v39 = vsel %vm420_vm1, %v819_v2, %v821_v38  ;;  %v827_v40 = vsel %vm420_vm1, %v821_v38, %v823_v35  ;;  %940 = vmatprep.subr.mxu1 %v1325_v0  ;;  %v779_v41 = vpop.permute.xlu0 %778 }
 0x296   : > { %861 = vmatprep.subr.mxu0 %v827_v40  ;;  %941 = vmatpush1.msra.mxu1 %v779_v41 }
 0x297   : > { %862 = vmatpush1.msra.mxu0 %v826_v39  ;;  %942 = vmatprep.subr.mxu1 %v1325_v0 }
 0x298   : > { %v799_v44 = vpop.permute.xlu1 %798  ;;  %863 = vmatprep.subr.mxu0 %v825_v42  ;;  %943 = vmatpush1.msra.mxu1 %v1795_v20  ;;  %v715_v20 = vsel %vm305_vm6, %v1815_v31, %v1807_v3 }
 0x299   : > { %v804_v45 = vsel %vm397_vm2, %v797_v5, %v799_v44  ;;  %864 = vmatpush1.msra.mxu0 %v824_v43  ;;  %v805_v46 = vsel %vm397_vm2, %v799_v44, %v801_v37  ;;  %944 = vmatprep.subr.mxu1 %v1325_v0  ;;  %v757_v47 = vpop.permute.xlu0 %756 }
 0x29a   : > { %865 = vmatprep.subr.mxu0 %v805_v46  ;;  %945 = vmatpush1.msra.mxu1 %v757_v47 }
 0x29b   : > { %866 = vmatpush1.msra.mxu0 %v804_v45  ;;  %946 = vmatprep.subr.mxu1 %v1325_v0 }
 0x29c   : > { %v777_v50 = vpop.permute.xlu1 %776  ;;  %867 = vmatprep.subr.mxu0 %v803_v48  ;;  %947 = vmatpush1.msra.mxu1 %v1799_v22  ;;  %v714_v22 = vsel %vm305_vm6, %v1801_v23, %v1815_v31 }
 0x29d   : > { %v782_v51 = vsel %vm374_vm3, %v775_v29, %v777_v50  ;;  %868 = vmatpush1.msra.mxu0 %v802_v49  ;;  %v783_v52 = vsel %vm374_vm3, %v777_v50, %v779_v41  ;;  %948 = vmatprep.subr.mxu1 %v1325_v0  ;;  %v735_v53 = vpop.permute.xlu0 %734 }
 0x29e   : > { %869 = vmatprep.subr.mxu0 %v783_v52  ;;  %949 = vmatpush1.msra.mxu1 %v735_v53 }
 0x29f   : > { %870 = vmatpush1.msra.mxu0 %v782_v51  ;;  %950 = vmatprep.subr.mxu1 %v1325_v0 }
 0x2a0   : > { %v755_v57 = vpop.permute.xlu1 %754  ;;  %871 = vmatprep.subr.mxu0 %v781_v54  ;;  %951 = vmatpush1.msra.mxu1 %v1803_v24 }
 0x2a1   : > { %v760_v58 = vsel %vm351_vm4, %v753_v30, %v755_v57  ;;  %872 = vmatpush1.msra.mxu0 %v780_v55  ;;  %v761_v59 = vsel %vm351_vm4, %v755_v57, %v757_v47  ;;  %952 = vmatprep.subr.mxu1 %v1325_v0  ;;  %v713_v60 = vpop.permute.xlu0 %712 }
 0x2a2   : > { %873 = vmatprep.subr.mxu0 %v761_v59  ;;  %953 = vmatpush1.msra.mxu1 %v713_v60 }
 0x2a3   : > { %874 = vmatpush1.msra.mxu0 %v760_v58  ;;  %954 = vmatprep.subr.mxu1 %v1325_v0 }
 0x2a4   : > { %v733_v7 = vpop.permute.xlu1 %732  ;;  %875 = vmatprep.subr.mxu0 %v759_v62  ;;  %955 = vmatpush1.msra.mxu1 %v1807_v3  ;;  %v693_v3 = vsel %vm282_vm7, %v1819_v33, %v1809_v1 }
 0x2a5   : > { %v738_v9 = vsel %vm328_vm5, %v1817_v32, %v733_v7  ;;  %876 = vmatpush1.msra.mxu0 %v758_v63  ;;  %v739_v13 = vsel %vm328_vm5, %v733_v7, %v735_v53  ;;  %956 = vmatprep.subr.mxu1 %v1325_v0  ;;  %v691_v14 = vpop.permute.xlu0 %690 }
 0x2a6   : > { %877 = vmatprep.subr.mxu0 %v739_v13  ;;  %957 = vmatpush1.msra.mxu1 %v691_v14 }
 0x2a7   : > { %878 = vmatpush1.msra.mxu0 %v738_v9  ;;  %958 = vmatprep.subr.mxu1 %v1325_v0 }
 0x2a8   : > { %v711_v17 = vpop.permute.xlu1 %710  ;;  %879 = vmatprep.subr.mxu0 %v737_v15  ;;  %959 = vmatpush1.msra.mxu1 %v1809_v1 }
 0x2a9   : > { %v716_v18 = vsel %vm305_vm6, %v1821_v34, %v711_v17  ;;  %880 = vmatpush1.msra.mxu0 %v736_v16  ;;  %v717_v19 = vsel %vm305_vm6, %v711_v17, %v713_v60  ;;  %960 = vmatprep.subr.mxu1 %v1325_v0  ;;  %v845_v21 = vpop.permute.xlu0 %844 }
 0x2aa   : > { %881 = vmatprep.subr.mxu0 %v717_v19  ;;  %961 = vmatpush1.msra.mxu1 %v1740_v12 }
 0x2ab   : > { %882 = vmatpush1.msra.mxu0 %v716_v18  ;;  %962 = vmatprep.subr.mxu1 %v1325_v0 }
 0x2ac   : > { %v689_v24 = vpop.permute.xlu1 %688  ;;  %883 = vmatprep.subr.mxu0 %v715_v20  ;;  %963 = vmatpush1.msra.mxu1 %v1690_v11  ;;  %v692_v11 = vsel %vm282_vm7, %v1805_v25, %v1819_v33 }
 0x2ad   : > { %v694_v26 = vsel %vm282_vm7, %v1824_v36, %v689_v24  ;;  %884 = vmatpush1.msra.mxu0 %v714_v22  ;;  %v695_v12 = vsel %vm282_vm7, %v689_v24, %v691_v14  ;;  %992 = vmatprep.subr.mxu1 %v1325_v0  ;;  %v837_v27 = vpop.permute.xlu0 %836 }
 0x2ae   : > { %885 = vmatprep.subr.mxu0 %v695_v12  ;;  %993 = vmatpush2.msra.mxu1 %v845_v21 }
 0x2af   : > { %886 = vmatpush1.msra.mxu0 %v694_v26  ;;  %994 = vmatprep.subr.mxu1 %v1325_v0 }
 0x2b0   : > { %v841_v23 = vpop.permute.xlu1 %840  ;;  %887 = vmatprep.subr.mxu0 %v693_v3 }
 0x2b1   : > { %888 = vmatpush1.msra.mxu0 %v692_v11  ;;  %v835_v25 = vpop.permute.xlu0 %834 }
 0x2b2   : > { %889 = vmatprep.subr.mxu0 %v1688_v10  ;;  %v856_v10 = vld [vmem:[%s1954_s3] sm:$0xff] }
 0x2b3   : > { %890 = vmatpush1.msra.mxu0 %v1681_v8 }
 0x2b4   : > { %v843_v2 = vpop.permute.xlu1 %842  ;;  %891 = vmatprep.subr.mxu0 %v1677_v61  ;;  %v846_v61 = vsel %vm443_vm8, %v835_v25, %v837_v27 }
 0x2b5   : > { %v848_v1 = vsel %vm443_vm8, %v841_v23, %v843_v2  ;;  %892 = vmatpush1.msra.mxu0 %v1673_v56  ;;  %v849_v0 = vsel %vm443_vm8, %v843_v2, %v845_v21 }
 0x2b6   : > { %921 = vmatprep.subr.mxu0 %v849_v0 }
 0x2b7   : > { %922 = vmatpush2.msra.mxu0 %v848_v1 }
 0x2b8   : > { %v839_v28 = vpop.permute.xlu1 %838 }
 0x2b9   : > { %995 = vmatpush2.msra.mxu1 %v839_v28  ;;  %v847_v8 = vsel %vm443_vm8, %v837_v27, %v839_v28 }
 0x2ba   : > { %923 = vmatprep.subr.mxu0 %v847_v8  ;;  %997 = vmatmul.mubr.f32.vlgmr.msra.gmra.mxu1 %v856_v10 }
 0x2bb   : > { %924 = vmatpush2.msra.mxu0 %v846_v61 }
 0x2bc   : > { %926 = vmatmul.mubr.f32.vlgmr.msra.gmra.mxu0 %v856_v10 }
 0x37a   : > { %v998_v56 = vpop.f32.mrf.mxu1 }
 0x37b   : > { %1005 = vst.msk [vmem:[%s257_s7 + $0x10] sm:$0xff] %vm1004_vm11, %v998_v56 }
 0x37c   : > { %v927_v5 = vpop.f32.mrf.mxu0  ;;  %v1000_v4 = vpop.f32.mrf.mxu1 }
 0x37d   : > { %1002 = vst [vmem:[%s257_s7] sm:$0xff] %v927_v5 }
 0x37e   : > { %v929_v29 = vpop.f32.mrf.mxu0 }
 0x37f   : > { %1003 = vst [vmem:[%s257_s7 + $0x8] sm:$0xff] %v929_v29 }
 0x380   : > { %1262 = shalt.err (!%p1259_p0)
}
 0x381   : > { %s1263_s23 = scalar_lea.hbm %s1019_s6, 384  ;;  %s1267_s24 = scalar_lea.hbm %s1956_s5, 768 }
 0x382   : > { %p1264_p5 = scmp.ne.s32.totalorder %s1019_s6, %s1263_s23  ;;  %p1268_p4 = scmp.lt.s32.totalorder %s1019_s6, %s1956_s5 }
 0x383   : > { %p1269_p6 = scmp.lt.s32.totalorder %s1267_s24, %s1263_s23 }
 0x384   : > { %p1265_p9 = pnand %p1264_p5, %p1972_p11 }
 0x385   : > { %p1270_p8 = por %p1269_p6, %p1268_p4 }
 0x386   : > { %p1266_p1 = pneg %p1265_p9 }
 0x388   : > { %p1271_p3 = pnand %p1270_p8, %p1266_p1 }
 0x38a   : > { %1274 = shalt.err (!%p1271_p3)
}
 0x38b   : > { %1128 = dma.vmem_to_hbm [thread:$0]  (%p1972_p11), %s1911_s8, 384, %s1019_s6, %s1007_s9  }
 0x38c PF: > { %s1033_s7 = sand.u32 1, %s1305_s18   ;;  %p1973_p7 = scmp.ne.s32.totalorder %s1962_s25, 0 }
 0x38d   : > { %p1974_p12 = scmp.ge.s32.totalorder %s1317_s21, 2  ;;  %s1034_s15 = scalar_lea.sflag [#allocation5], %s1033_s7 }
 0x38f   : > { %p1139_p10 = pnand %p1974_p12, %p1973_p7 }
 0x391   : > { %p1140_p2 = pneg %p1139_p10 }
 0x393   : > { %1300 = dma.done.wait (%p1140_p2), %s1034_s15, 384  }
 0x394   : > { %1302 = vsyncadd (%p1140_p2), %s1034_s15, 4294966912  ;;  %p19_p13 = scmp.ge.s32.totalorder %s1420_s30, 4   ;;  %s1975_s18 = smov %s1309_s19 }
 0x395   : > { %s1976_s19 = smov %s1313_s20  ;;  %s1977_s20 = smov %s1437_s13 }
 0x396   : > { %s1978_s21 = smov %s1420_s30  ;;  %21 = sbr.rel (!%p19_p13) target bundleno = 6 (0x6), region = 89 }
 0x39b   :  { %1039 = vsyncpa [#allocation4], 1 }
 0x39c   :  { %1041 = vsyncpa [#allocation4 + $0x1], 1 }
 0x39d   :  { %1042 = vsyncpa [#allocation7], 1 }
 0x39e   :  { %1043 = vsyncpa [#allocation5], 1 }
 0x39f   :  { %1045 = vsyncpa [#allocation5 + $0x1], 1 }

</bundles_post_ra>
